<compile_context>
chip_gen: v6e
topology: v6e:2x2x1
jax: 0.10.0
libtpu: 0.0.40
codegen_flags: <defaults>
</compile_context>

<pallas_src>
import jax
import jax.numpy as jnp
from jax.experimental import pallas as pl
from jax.experimental.pallas import tpu as pltpu


# --------------------------------------------------------------------------- #
# Kernel
# --------------------------------------------------------------------------- #
def mha_flash_kernel(q_ref, k_ref, v_ref, bias_ref, wt_ref, b_ref, o_ref,
                     m_scr, l_scr, acc_scr, ctx_scr):
    """One (batch, q-tile, k-tile) grid step.

    q_ref:    (H, BQ, D) bf16   (same q tile revisited for every k tile)
    k_ref:    (H, BK, D) bf16
    v_ref:    (H, BK, D) bf16
    bias_ref: (BQ, BK)   bf16   additive mask bias (0 keep / -1e20*scale masked)
    wt_ref:   (E, E)     bf16   fc_out.weight.T
    b_ref:    (1, E)     f32    fc_out.bias
    o_ref:    (BQ, E)    output (written only on the last k tile)
    m_scr:    (H, BQ, 1) f32    running max
    l_scr:    (H, BQ, 1) f32    running softmax denominator
    acc_scr:  (H, BQ, D) f32    running softmax numerator (attn @ V)
    ctx_scr:  (BQ, E)    bf16   heads->lanes staging for the fc_out matmul
    """
    ki = pl.program_id(2)

    @pl.when(ki == 0)
    def _():
        m_scr[...] = jnp.full_like(m_scr, -jnp.inf)
        l_scr[...] = jnp.zeros_like(l_scr)
        acc_scr[...] = jnp.zeros_like(acc_scr)

    heads, bq, hd = q_ref.shape
    embed = wt_ref.shape[0]
    scale = 1.0 / (embed ** 0.5)

    # Scale q (H*BQ*D elems) instead of the (H,BQ,K) logits (VPU savings).
    q = q_ref[...] * scale                                            # bf16

    # All-heads QK^T on the MXU: bf16 operands, fp32 accumulation.
    s = jnp.einsum('hqd,hkd->hqk', q, k_ref[...],
                   preferred_element_type=jnp.float32)                # (H,BQ,BK)

    # Additive mask bias (single VPU add), broadcast over heads.  Matches
    # torch's masked_fill(-1e20) before scaling: kept logits unchanged, masked
    # logits ~= -1e20/sqrt(E).
    s = s + bias_ref[...][None, :, :]

    # Online (flash) softmax update, fp32 throughout (v5e-safe).
    m_prev = m_scr[...]
    m_new = jnp.maximum(m_prev, jnp.max(s, axis=-1, keepdims=True))   # (H,BQ,1)
    alpha = jnp.exp(m_prev - m_new)
    p = jnp.exp(s - m_new)                                            # (H,BQ,BK)
    l_scr[...] = alpha * l_scr[...] + jnp.sum(p, axis=-1, keepdims=True)
    acc_scr[...] = alpha * acc_scr[...] + jnp.einsum(
        'hqk,hkd->hqd', p.astype(jnp.bfloat16), v_ref[...],
        preferred_element_type=jnp.float32)                           # (H,BQ,D)
    m_scr[...] = m_new

    @pl.when(ki == pl.num_programs(2) - 1)
    def _():
        inv_l = pl.reciprocal(l_scr[...], approx=True)                # EUP slot
        ctx = (acc_scr[...] * inv_l).astype(jnp.bfloat16)             # (H,BQ,D)
        # Pack heads into lanes ONCE per q tile (static lane-slice stores),
        # then run fc_out as a single full-width E-contraction matmul instead
        # of H small D-contraction dots with a serial fp32 accumulator chain.
        for h in range(heads):                                        # static unroll
            ctx_scr[:, h * hd:(h + 1) * hd] = ctx[h]
        out = jnp.dot(ctx_scr[...], wt_ref[...],
                      preferred_element_type=jnp.float32)             # (BQ,E)
        o_ref[...] = (out + b_ref[...]).astype(o_ref.dtype)


# --------------------------------------------------------------------------- #
# Tiling / VMEM heuristics
# --------------------------------------------------------------------------- #
def _vmem_budget_bytes():
    """~80% of per-core VMEM (≈51 MiB on v7x, ≈102 MiB on v5e/v6e): leaves
    headroom for compiler-internal scratch and the double-buffered pipeline."""
    try:
        cap = getattr(pltpu.get_tpu_info(), "vmem_capacity_bytes", None)
        if cap:
            return int(cap * 0.8)
    except Exception:
        pass
    return 48 * 1024 * 1024   # safe on every generation if the query fails


def _vmem_estimate_bytes(heads, bq, bk, d, e, out_itemsize):
    """Enumerated working-set estimate: double-buffered blocks + scratch +
    in-flight temporaries, with a 1.25x fudge factor."""
    blocks = (heads * bq * d * 2          # q (bf16)
              + 2 * heads * bk * d * 2    # k + v (bf16)
              + bq * bk * 2               # mask bias (bf16)
              + e * e * 2                 # fc_out W.T (bf16)
              + e * 4                     # fc_out bias (f32)
              + bq * e * out_itemsize)    # output block
    scratch = (2 * heads * bq + heads * bq * d) * 4 + bq * e * 2      # m,l,acc,ctx
    temps = (3 * heads * bq * bk * 4      # s / p fp32 live copies
             + heads * bq * d * 6         # p@v fp32 + ctx bf16
             + bq * e * 6)                # fc_out result f32 + staging reads
    return int(1.25 * (2 * blocks + scratch + temps))


def _block_candidates(length, target, multiples):
    """Divisors of `length` <= target that are multiples of `multiples`
    (preferred order), descending within each group; full extent as fallback."""
    cands = []
    if length <= target:
        cands.append(length)
    for m in multiples:
        b = (min(target, length) // m) * m
        while b >= m:
            if length % b == 0 and b not in cands:
                cands.append(b)
            b -= m
    if length not in cands:
        cands.append(length)
    return cands


def _pick_blocks(n, q_len, k_len, heads, d, e, out_itemsize, budget):
    # Bigger Q tiles where VMEM allows (v5e/v6e); 256 on v7x-class budgets.
    q_target = 512 if budget >= 80 * 1024 * 1024 else 256
    # block_q: multiple of 32 preferred (sublane packing for bf16/int8 blocks).
    q_cands = _block_candidates(q_len, q_target, (32, 16, 8))
    # block_k: must be a multiple of 128 (lane dim of the mask-bias block) or K.
    k_cands = _block_candidates(k_len, 512, (128,))

    chosen = None
    for bq in q_cands:                       # prefer large Q tiles,
        for bk in k_cands:                   # shrink the K tile first
            if _vmem_estimate_bytes(heads, bq, bk, d, e, out_itemsize) <= budget:
                chosen = (bq, bk)
                break
        if chosen is not None:
            break
    if chosen is None:
        chosen = (min(q_cands), min(k_cands))
    block_q, block_k = chosen

    # v7x has 2 TensorCores: expose >= 2 steps on the parallel axes if possible.
    if n * (q_len // block_q) < 2:
        for bq in q_cands:
            if (q_len // bq >= 2 and
                    _vmem_estimate_bytes(heads, bq, block_k, d, e,
                                         out_itemsize) <= budget):
                block_q = bq
                break
    return block_q, block_k


# --------------------------------------------------------------------------- #
# Wrapper
# --------------------------------------------------------------------------- #
def multihead_attention_pallas(values, keys, query, mask, w_out, b_out, heads):
    """values/keys: (N, K, E); query: (N, Q, E); mask broadcastable to (N,1,Q,K)."""
    N, Q, E = query.shape
    K = keys.shape[1]
    D = E // heads
    assert D * heads == E, "embed_size must be divisible by heads"

    out_dtype = query.dtype
    scale = 1.0 / (E ** 0.5)

    # (N, L, E) -> (N, H, L, D): layout plumbing done by XLA outside the kernel;
    # cast to bf16 so in-kernel matmuls hit the native MXU path.
    q4 = query.reshape(N, Q, heads, D).transpose(0, 2, 1, 3).astype(jnp.bfloat16)
    k4 = keys.reshape(N, K, heads, D).transpose(0, 2, 1, 3).astype(jnp.bfloat16)
    v4 = values.reshape(N, K, heads, D).transpose(0, 2, 1, 3).astype(jnp.bfloat16)

    # Additive mask bias (0 keep / -1e20*scale masked), shared across heads —
    # mirrors the usual (N,1,Q,K) torch mask.
    # TODO(synk): per-head (N, H, Q, K) masks are not supported by this wrapper.
    mask_b = jnp.broadcast_to(mask, (N, 1, Q, K)).reshape(N, Q, K)
    bias = jnp.where(mask_b == 0, jnp.float32(-1e20 * scale),
                     jnp.float32(0.0)).astype(jnp.bfloat16)

    wt = w_out.T.astype(jnp.bfloat16)            # (E, E): out = ctx_flat @ W.T
    bvec = b_out.reshape(1, E).astype(jnp.float32)

    budget = _vmem_budget_bytes()
    block_q, block_k = _pick_blocks(N, Q, K, heads, D, E,
                                    jnp.dtype(out_dtype).itemsize, budget)
    grid = (N, Q // block_q, K // block_k)

    return pl.pallas_call(
        mha_flash_kernel,
        out_shape=jax.ShapeDtypeStruct((N, Q, E), out_dtype),
        grid=grid,
        in_specs=[
            pl.BlockSpec((None, heads, block_q, D), lambda n, qi, ki: (n, 0, qi, 0)),  # q
            pl.BlockSpec((None, heads, block_k, D), lambda n, qi, ki: (n, 0, ki, 0)),  # k
            pl.BlockSpec((None, heads, block_k, D), lambda n, qi, ki: (n, 0, ki, 0)),  # v
            pl.BlockSpec((None, block_q, block_k),  lambda n, qi, ki: (n, qi, ki)),    # mask bias
            pl.BlockSpec((E, E),                    lambda n, qi, ki: (0, 0)),         # fc_out W.T
            pl.BlockSpec((1, E),                    lambda n, qi, ki: (0, 0)),         # fc_out bias
        ],
        out_specs=pl.BlockSpec((None, block_q, E), lambda n, qi, ki: (n, qi, 0)),
        scratch_shapes=[
            pltpu.VMEM((heads, block_q, 1), jnp.float32),   # running max
            pltpu.VMEM((heads, block_q, 1), jnp.float32),   # running denom
            pltpu.VMEM((heads, block_q, D), jnp.float32),   # running numerator
            pltpu.VMEM((block_q, E), jnp.bfloat16),         # heads->lanes staging
        ],
        compiler_params=pltpu.CompilerParams(
            dimension_semantics=("parallel", "parallel", "arbitrary"),
            vmem_limit_bytes=budget),
    )(q4, k4, v4, bias, wt, bvec)


# --------------------------------------------------------------------------- #
# Pure-JAX reference (mirrors the PyTorch forward exactly, fp32)
# --------------------------------------------------------------------------- #
def multihead_attention_ref(values, keys, query, mask, w_out, b_out, heads):
    N, Q, E = query.shape
    K = keys.shape[1]
    D = E // heads
    v4 = values.reshape(N, K, heads, D)
    k4 = keys.reshape(N, K, heads, D)
    q4 = query.reshape(N, Q, heads, D)
    energy = jnp.einsum('nqhd,nkhd->nhqk', q4, k4,
                        precision=jax.lax.Precision.HIGHEST)
    energy = jnp.where(mask == 0, jnp.float32(-1e20), energy)
    attn = jax.nn.softmax(energy / (E ** 0.5), axis=3)
    out = jnp.einsum('nhqk,nkhd->nqhd', attn, v4,
                     precision=jax.lax.Precision.HIGHEST).reshape(N, Q, E)
    return jnp.dot(out, w_out.T, precision=jax.lax.Precision.HIGHEST) + b_out


if __name__ == "__main__":
    N, SEQ, E, H = 2, 8, 32, 4   # batch, seq_len, embed_size, heads

    key = jax.random.PRNGKey(0)
    kv_, kk_, kq_, kw_, kb_ = jax.random.split(key, 5)

    values = jax.random.normal(kv_, (N, SEQ, E), dtype=jnp.float32)
    keys   = jax.random.normal(kk_, (N, SEQ, E), dtype=jnp.float32)
    query  = jax.random.normal(kq_, (N, SEQ, E), dtype=jnp.float32)

    # Causal mask, shape (N, 1, Q, K) like the typical torch usage.
    mask = jnp.tril(jnp.ones((SEQ, SEQ), dtype=jnp.float32))[None, None]
    mask = jnp.broadcast_to(mask, (N, 1, SEQ, SEQ))

    # Deterministic fc_out parameters (nn.Linear(E, E) with bias).
    bound = 1.0 / (E ** 0.5)
    w_out = jax.random.uniform(kw_, (E, E), jnp.float32, -bound, bound)
    b_out = jax.random.uniform(kb_, (E,),   jnp.float32, -bound, bound)

    out = multihead_attention_pallas(values, keys, query, mask, w_out, b_out, H)
    out = jax.block_until_ready(out)

    ref = multihead_attention_ref(values, keys, query, mask, w_out, b_out, H)
    assert out.shape == (N, SEQ, E)
    # Tolerance relaxed for bf16 MXU matmuls + approx reciprocal.
    assert jnp.allclose(out, ref, rtol=5e-2, atol=5e-2), \
        f"max abs err {jnp.max(jnp.abs(out - ref))}"

    print("KERNEL_OK")
</pallas_src>

<mosaic_0001>
module attributes {stable_mosaic.version = 11 : i64} {
  func.func @mha_flash_kernel(%arg0: i32, %arg1: i32, %arg2: i32, %arg3: memref<1x4x8x8xbf16, #tpu.memory_space<vmem>>, %arg4: memref<1x4x8x8xbf16, #tpu.memory_space<vmem>>, %arg5: memref<1x4x8x8xbf16, #tpu.memory_space<vmem>>, %arg6: memref<1x8x8xbf16, #tpu.memory_space<vmem>>, %arg7: memref<32x32xbf16, #tpu.memory_space<vmem>>, %arg8: memref<1x32xf32, #tpu.memory_space<vmem>>, %arg9: memref<1x8x32xf32, #tpu.memory_space<vmem>>, %arg10: memref<4x8x1xf32, #tpu.memory_space<vmem>>, %arg11: memref<4x8x1xf32, #tpu.memory_space<vmem>>, %arg12: memref<4x8x8xf32, #tpu.memory_space<vmem>>, %arg13: memref<8x32xbf16, #tpu.memory_space<vmem>>) attributes {dimension_semantics = [#tpu.dimension_semantics<parallel>, #tpu.dimension_semantics<parallel>, #tpu.dimension_semantics<arbitrary>], iteration_bounds = array<i64: 2, 1, 1>, scalar_prefetch = 0 : i64, scratch_operands = 4 : i64, tpu.core_type = #tpu.core_type<tc>, window_params = [{transform_indices = @transform_0, window_bounds = array<i64: 1, 4, 8, 8>}, {transform_indices = @transform_1, window_bounds = array<i64: 1, 4, 8, 8>}, {transform_indices = @transform_2, window_bounds = array<i64: 1, 4, 8, 8>}, {transform_indices = @transform_3, window_bounds = array<i64: 1, 8, 8>}, {pipeline_mode = #tpu.pipeline_mode<synchronous>, transform_indices = @transform_4, window_bounds = array<i64: 32, 32>}, {pipeline_mode = #tpu.pipeline_mode<synchronous>, transform_indices = @transform_5, window_bounds = array<i64: 1, 32>}, {transform_indices = @transform_6, window_bounds = array<i64: 1, 8, 32>}]} {
    %c0_i32 = arith.constant 0 : i32
    %0 = arith.cmpi eq, %arg2, %c0_i32 : i32
    %1 = arith.extui %0 : i1 to i32
    %c0_i32_0 = arith.constant 0 : i32
    %2 = arith.cmpi ne, %1, %c0_i32_0 : i32
    scf.if %2 {
      %cst_39 = arith.constant 0xFF800000 : f32
      %44 = vector.broadcast %cst_39 : f32 to vector<4x8x1xf32>
      %c0_40 = arith.constant 0 : index
      %c0_41 = arith.constant 0 : index
      %c0_42 = arith.constant 0 : index
      %45 = vector.load %arg10[%c0_40, %c0_41, %c0_42] : memref<4x8x1xf32, #tpu.memory_space<vmem>>, vector<4x8x1xf32>
      tpu.vector_store %arg10[%c0_40, %c0_41, %c0_42], %44 {strides = array<i32>} : memref<4x8x1xf32, #tpu.memory_space<vmem>>, vector<4x8x1xf32>,
      %cst_43 = arith.constant 0.000000e+00 : f32
      %46 = vector.broadcast %cst_43 : f32 to vector<4x8x1xf32>
      %c0_44 = arith.constant 0 : index
      %c0_45 = arith.constant 0 : index
      %c0_46 = arith.constant 0 : index
      %47 = vector.load %arg11[%c0_44, %c0_45, %c0_46] : memref<4x8x1xf32, #tpu.memory_space<vmem>>, vector<4x8x1xf32>
      tpu.vector_store %arg11[%c0_44, %c0_45, %c0_46], %46 {strides = array<i32>} : memref<4x8x1xf32, #tpu.memory_space<vmem>>, vector<4x8x1xf32>,
      %cst_47 = arith.constant 0.000000e+00 : f32
      %48 = vector.broadcast %cst_47 : f32 to vector<4x8x8xf32>
      %c0_48 = arith.constant 0 : index
      %c0_49 = arith.constant 0 : index
      %c0_50 = arith.constant 0 : index
      %49 = vector.load %arg12[%c0_48, %c0_49, %c0_50] : memref<4x8x8xf32, #tpu.memory_space<vmem>>, vector<4x8x8xf32>
      tpu.vector_store %arg12[%c0_48, %c0_49, %c0_50], %48 {strides = array<i32>} : memref<4x8x8xf32, #tpu.memory_space<vmem>>, vector<4x8x8xf32>,
    } else {
    }
    %c0 = arith.constant 0 : index
    %c0_1 = arith.constant 0 : index
    %c0_2 = arith.constant 0 : index
    %c0_3 = arith.constant 0 : index
    %3 = vector.load %arg3[%c0, %c0_1, %c0_2, %c0_3] : memref<1x4x8x8xbf16, #tpu.memory_space<vmem>>, vector<1x4x8x8xbf16>
    %4 = vector.shape_cast %3 : vector<1x4x8x8xbf16> to vector<4x8x8xbf16>
    %cst = arith.constant 1.767580e-01 : bf16
    %5 = vector.broadcast %cst : bf16 to vector<4x8x8xbf16>
    %6 = arith.mulf %4, %5 : vector<4x8x8xbf16>
    %c0_4 = arith.constant 0 : index
    %c0_5 = arith.constant 0 : index
    %c0_6 = arith.constant 0 : index
    %c0_7 = arith.constant 0 : index
    %7 = vector.load %arg4[%c0_4, %c0_5, %c0_6, %c0_7] : memref<1x4x8x8xbf16, #tpu.memory_space<vmem>>, vector<1x4x8x8xbf16>
    %8 = vector.shape_cast %7 : vector<1x4x8x8xbf16> to vector<4x8x8xbf16>
    "tpu.trace_start"() <{level = 10 : i32, message = "hqd,hkd->hqk"}> : () -> ()
    %cst_8 = arith.constant dense<0.000000e+00> : vector<4x8x8xf32>
    %9 = tpu.matmul %6, %8, %cst_8 {dimension_numbers = #tpu.dot_dimension_numbers<[2], [2], [1], [1], [0, 0, 0, 1, 1, 1], [0], [0]>} : vector<4x8x8xbf16>, vector<4x8x8xbf16>, vector<4x8x8xf32> -> vector<4x8x8xf32>
    "tpu.trace_stop"() : () -> ()
    %c0_9 = arith.constant 0 : index
    %c0_10 = arith.constant 0 : index
    %c0_11 = arith.constant 0 : index
    %10 = vector.load %arg6[%c0_9, %c0_10, %c0_11] : memref<1x8x8xbf16, #tpu.memory_space<vmem>>, vector<1x8x8xbf16>
    %11 = vector.shape_cast %10 : vector<1x8x8xbf16> to vector<8x8xbf16>
    %12 = vector.shape_cast %11 : vector<8x8xbf16> to vector<1x8x8xbf16>
    %13 = arith.extf %12 : vector<1x8x8xbf16> to vector<1x8x8xf32>
    %14 = vector.broadcast %13 : vector<1x8x8xf32> to vector<4x8x8xf32>
    %15 = arith.addf %9, %14 : vector<4x8x8xf32>
    %c0_12 = arith.constant 0 : index
    %c0_13 = arith.constant 0 : index
    %c0_14 = arith.constant 0 : index
    %16 = vector.load %arg10[%c0_12, %c0_13, %c0_14] : memref<4x8x1xf32, #tpu.memory_space<vmem>>, vector<4x8x1xf32>
    %cst_15 = arith.constant dense<0xFF800000> : vector<4x8xf32>
    %17 = vector.multi_reduction <maximumf>, %15, %cst_15 [2] : vector<4x8x8xf32> to vector<4x8xf32>
    %18 = vector.shape_cast %17 : vector<4x8xf32> to vector<4x8x1xf32>
    %19 = arith.maximumf %16, %18 : vector<4x8x1xf32>
    %20 = arith.subf %16, %19 : vector<4x8x1xf32>
    %21 = math.exp %20 : vector<4x8x1xf32>
    %22 = vector.broadcast %19 : vector<4x8x1xf32> to vector<4x8x8xf32>
    %23 = arith.subf %15, %22 : vector<4x8x8xf32>
    %24 = math.exp %23 : vector<4x8x8xf32>
    %c0_16 = arith.constant 0 : index
    %c0_17 = arith.constant 0 : index
    %c0_18 = arith.constant 0 : index
    %25 = vector.load %arg11[%c0_16, %c0_17, %c0_18] : memref<4x8x1xf32, #tpu.memory_space<vmem>>, vector<4x8x1xf32>
    %26 = arith.mulf %21, %25 : vector<4x8x1xf32>
    %cst_19 = arith.constant dense<0.000000e+00> : vector<4x8xf32>
    %27 = vector.multi_reduction <add>, %24, %cst_19 [2] : vector<4x8x8xf32> to vector<4x8xf32>
    %28 = vector.shape_cast %27 : vector<4x8xf32> to vector<4x8x1xf32>
    %29 = arith.addf %26, %28 : vector<4x8x1xf32>
    %c0_20 = arith.constant 0 : index
    %c0_21 = arith.constant 0 : index
    %c0_22 = arith.constant 0 : index
    %30 = vector.load %arg11[%c0_20, %c0_21, %c0_22] : memref<4x8x1xf32, #tpu.memory_space<vmem>>, vector<4x8x1xf32>
    tpu.vector_store %arg11[%c0_20, %c0_21, %c0_22], %29 {strides = array<i32>} : memref<4x8x1xf32, #tpu.memory_space<vmem>>, vector<4x8x1xf32>,
    %c0_23 = arith.constant 0 : index
    %c0_24 = arith.constant 0 : index
    %c0_25 = arith.constant 0 : index
    %31 = vector.load %arg12[%c0_23, %c0_24, %c0_25] : memref<4x8x8xf32, #tpu.memory_space<vmem>>, vector<4x8x8xf32>
    %32 = vector.broadcast %21 : vector<4x8x1xf32> to vector<4x8x8xf32>
    %33 = arith.mulf %32, %31 : vector<4x8x8xf32>
    %34 = arith.truncf %24 : vector<4x8x8xf32> to vector<4x8x8xbf16>
    %c0_26 = arith.constant 0 : index
    %c0_27 = arith.constant 0 : index
    %c0_28 = arith.constant 0 : index
    %c0_29 = arith.constant 0 : index
    %35 = vector.load %arg5[%c0_26, %c0_27, %c0_28, %c0_29] : memref<1x4x8x8xbf16, #tpu.memory_space<vmem>>, vector<1x4x8x8xbf16>
    %36 = vector.shape_cast %35 : vector<1x4x8x8xbf16> to vector<4x8x8xbf16>
    "tpu.trace_start"() <{level = 10 : i32, message = "hqk,hkd->hqd"}> : () -> ()
    %cst_30 = arith.constant dense<0.000000e+00> : vector<4x8x8xf32>
    %37 = tpu.matmul %34, %36, %cst_30 {dimension_numbers = #tpu.dot_dimension_numbers<[2], [1], [1], [2], [0, 0, 0, 1, 1, 2], [0], [0]>} : vector<4x8x8xbf16>, vector<4x8x8xbf16>, vector<4x8x8xf32> -> vector<4x8x8xf32>
    "tpu.trace_stop"() : () -> ()
    %38 = arith.addf %33, %37 : vector<4x8x8xf32>
    %c0_31 = arith.constant 0 : index
    %c0_32 = arith.constant 0 : index
    %c0_33 = arith.constant 0 : index
    %39 = vector.load %arg12[%c0_31, %c0_32, %c0_33] : memref<4x8x8xf32, #tpu.memory_space<vmem>>, vector<4x8x8xf32>
    tpu.vector_store %arg12[%c0_31, %c0_32, %c0_33], %38 {strides = array<i32>} : memref<4x8x8xf32, #tpu.memory_space<vmem>>, vector<4x8x8xf32>,
    %c0_34 = arith.constant 0 : index
    %c0_35 = arith.constant 0 : index
    %c0_36 = arith.constant 0 : index
    %40 = vector.load %arg10[%c0_34, %c0_35, %c0_36] : memref<4x8x1xf32, #tpu.memory_space<vmem>>, vector<4x8x1xf32>
    tpu.vector_store %arg10[%c0_34, %c0_35, %c0_36], %19 {strides = array<i32>} : memref<4x8x1xf32, #tpu.memory_space<vmem>>, vector<4x8x1xf32>,
    %c0_i32_37 = arith.constant 0 : i32
    %41 = arith.cmpi eq, %arg2, %c0_i32_37 : i32
    %42 = arith.extui %41 : i1 to i32
    %c0_i32_38 = arith.constant 0 : i32
    %43 = arith.cmpi ne, %42, %c0_i32_38 : i32
    scf.if %43 {
      %c0_39 = arith.constant 0 : index
      %c0_40 = arith.constant 0 : index
      %c0_41 = arith.constant 0 : index
      %44 = vector.load %arg11[%c0_39, %c0_40, %c0_41] : memref<4x8x1xf32, #tpu.memory_space<vmem>>, vector<4x8x1xf32>
      %45 = tpu.reciprocal %44 {approx = true} : vector<4x8x1xf32> -> vector<4x8x1xf32>
      %c0_42 = arith.constant 0 : index
      %c0_43 = arith.constant 0 : index
      %c0_44 = arith.constant 0 : index
      %46 = vector.load %arg12[%c0_42, %c0_43, %c0_44] : memref<4x8x8xf32, #tpu.memory_space<vmem>>, vector<4x8x8xf32>
      %47 = vector.broadcast %45 : vector<4x8x1xf32> to vector<4x8x8xf32>
      %48 = arith.mulf %46, %47 : vector<4x8x8xf32>
      %49 = arith.truncf %48 : vector<4x8x8xf32> to vector<4x8x8xbf16>
      %50 = vector.extract_strided_slice %49 {offsets = [0, 0, 0], sizes = [1, 8, 8], strides = [1, 1, 1]} : vector<4x8x8xbf16> to vector<1x8x8xbf16>
      %51 = vector.shape_cast %50 : vector<1x8x8xbf16> to vector<8x8xbf16>
      %c0_45 = arith.constant 0 : index
      %c0_46 = arith.constant 0 : index
      %52 = vector.load %arg13[%c0_45, %c0_46] : memref<8x32xbf16, #tpu.memory_space<vmem>>, vector<8x8xbf16>
      tpu.vector_store %arg13[%c0_45, %c0_46], %51 {strides = array<i32>} : memref<8x32xbf16, #tpu.memory_space<vmem>>, vector<8x8xbf16>,
      %53 = vector.extract_strided_slice %49 {offsets = [1, 0, 0], sizes = [1, 8, 8], strides = [1, 1, 1]} : vector<4x8x8xbf16> to vector<1x8x8xbf16>
      %54 = vector.shape_cast %53 : vector<1x8x8xbf16> to vector<8x8xbf16>
      %c0_47 = arith.constant 0 : index
      %c8 = arith.constant 8 : index
      %55 = vector.load %arg13[%c0_47, %c8] : memref<8x32xbf16, #tpu.memory_space<vmem>>, vector<8x8xbf16>
      tpu.vector_store %arg13[%c0_47, %c8], %54 {strides = array<i32>} : memref<8x32xbf16, #tpu.memory_space<vmem>>, vector<8x8xbf16>,
      %56 = vector.extract_strided_slice %49 {offsets = [2, 0, 0], sizes = [1, 8, 8], strides = [1, 1, 1]} : vector<4x8x8xbf16> to vector<1x8x8xbf16>
      %57 = vector.shape_cast %56 : vector<1x8x8xbf16> to vector<8x8xbf16>
      %c0_48 = arith.constant 0 : index
      %c16 = arith.constant 16 : index
      %58 = vector.load %arg13[%c0_48, %c16] : memref<8x32xbf16, #tpu.memory_space<vmem>>, vector<8x8xbf16>
      tpu.vector_store %arg13[%c0_48, %c16], %57 {strides = array<i32>} : memref<8x32xbf16, #tpu.memory_space<vmem>>, vector<8x8xbf16>,
      %59 = vector.extract_strided_slice %49 {offsets = [3, 0, 0], sizes = [1, 8, 8], strides = [1, 1, 1]} : vector<4x8x8xbf16> to vector<1x8x8xbf16>
      %60 = vector.shape_cast %59 : vector<1x8x8xbf16> to vector<8x8xbf16>
      %c0_49 = arith.constant 0 : index
      %c24 = arith.constant 24 : index
      %61 = vector.load %arg13[%c0_49, %c24] : memref<8x32xbf16, #tpu.memory_space<vmem>>, vector<8x8xbf16>
      tpu.vector_store %arg13[%c0_49, %c24], %60 {strides = array<i32>} : memref<8x32xbf16, #tpu.memory_space<vmem>>, vector<8x8xbf16>,
      %c0_50 = arith.constant 0 : index
      %c0_51 = arith.constant 0 : index
      %62 = vector.load %arg13[%c0_50, %c0_51] : memref<8x32xbf16, #tpu.memory_space<vmem>>, vector<8x32xbf16>
      %c0_52 = arith.constant 0 : index
      %c0_53 = arith.constant 0 : index
      %63 = vector.load %arg7[%c0_52, %c0_53] : memref<32x32xbf16, #tpu.memory_space<vmem>>, vector<32x32xbf16>
      %cst_54 = arith.constant dense<0.000000e+00> : vector<8x32xf32>
      %64 = tpu.matmul %62, %63, %cst_54 {dimension_numbers = #tpu.dot_dimension_numbers<[1], [0], [0], [1], [0, 0, 1, 1], [], []>} : vector<8x32xbf16>, vector<32x32xbf16>, vector<8x32xf32> -> vector<8x32xf32>
      %c0_55 = arith.constant 0 : index
      %c0_56 = arith.constant 0 : index
      %65 = vector.load %arg8[%c0_55, %c0_56] : memref<1x32xf32, #tpu.memory_space<vmem>>, vector<1x32xf32>
      %66 = vector.broadcast %65 : vector<1x32xf32> to vector<8x32xf32>
      %67 = arith.addf %64, %66 : vector<8x32xf32>
      %c0_57 = arith.constant 0 : index
      %c0_58 = arith.constant 0 : index
      %c0_59 = arith.constant 0 : index
      %68 = vector.load %arg9[%c0_57, %c0_58, %c0_59] : memref<1x8x32xf32, #tpu.memory_space<vmem>>, vector<1x8x32xf32>
      %69 = vector.shape_cast %68 : vector<1x8x32xf32> to vector<8x32xf32>
      %70 = vector.shape_cast %67 : vector<8x32xf32> to vector<1x8x32xf32>
      tpu.vector_store %arg9[%c0_57, %c0_58, %c0_59], %70 {strides = array<i32>} : memref<1x8x32xf32, #tpu.memory_space<vmem>>, vector<1x8x32xf32>,
    } else {
    }
    return
  }
  func.func @transform_0(%arg0: i32, %arg1: i32, %arg2: i32) -> (i32, i32, i32, i32) {
    %c0_i32 = arith.constant 0 : i32
    %c0_i32_0 = arith.constant 0 : i32
    %c0_i32_1 = arith.constant 0 : i32
    return %arg0, %c0_i32, %arg1, %c0_i32_0 : i32, i32, i32, i32
  }
  func.func @transform_1(%arg0: i32, %arg1: i32, %arg2: i32) -> (i32, i32, i32, i32) {
    %c0_i32 = arith.constant 0 : i32
    %c0_i32_0 = arith.constant 0 : i32
    %c0_i32_1 = arith.constant 0 : i32
    return %arg0, %c0_i32, %arg2, %c0_i32_0 : i32, i32, i32, i32
  }
  func.func @transform_2(%arg0: i32, %arg1: i32, %arg2: i32) -> (i32, i32, i32, i32) {
    %c0_i32 = arith.constant 0 : i32
    %c0_i32_0 = arith.constant 0 : i32
    %c0_i32_1 = arith.constant 0 : i32
    return %arg0, %c0_i32, %arg2, %c0_i32_0 : i32, i32, i32, i32
  }
  func.func @transform_3(%arg0: i32, %arg1: i32, %arg2: i32) -> (i32, i32, i32) {
    %c0_i32 = arith.constant 0 : i32
    return %arg0, %arg1, %arg2 : i32, i32, i32
  }
  func.func @transform_4(%arg0: i32, %arg1: i32, %arg2: i32) -> (i32, i32) {
    %c0_i32 = arith.constant 0 : i32
    %c0_i32_0 = arith.constant 0 : i32
    %c0_i32_1 = arith.constant 0 : i32
    return %c0_i32, %c0_i32_0 : i32, i32
  }
  func.func @transform_5(%arg0: i32, %arg1: i32, %arg2: i32) -> (i32, i32) {
    %c0_i32 = arith.constant 0 : i32
    %c0_i32_0 = arith.constant 0 : i32
    %c0_i32_1 = arith.constant 0 : i32
    return %c0_i32, %c0_i32_0 : i32, i32
  }
  func.func @transform_6(%arg0: i32, %arg1: i32, %arg2: i32) -> (i32, i32, i32) {
    %c0_i32 = arith.constant 0 : i32
    %c0_i32_0 = arith.constant 0 : i32
    return %arg0, %arg1, %c0_i32 : i32, i32, i32
  }
}

</mosaic_0001>

<bundles_post_ra>
// kernel: tpu_custom_call.1
= control target key start
LH: loop header
LB: loop body
LE: loop exit
PB: predicated region body
PF: predicated region fallthrough
CT: control target
= control target key end

     0   :  { %s2238_s0 = inlined_call_operand.hbm [shape: bf16[2,4,8,8], index: 0, kind: input, shape index: {}]   ;;  %s2239_s1 = inlined_call_operand.hbm [shape: bf16[2,4,8,8], index: 1, kind: input, shape index: {}]   ;;  %s2240_s2 = inlined_call_operand.hbm [shape: bf16[2,4,8,8], index: 2, kind: input, shape index: {}]   ;;  %s2241_s3 = inlined_call_operand.hbm [shape: bf16[2,8,8], index: 3, kind: input, shape index: {}]   ;;  %s2242_s4 = inlined_call_operand.hbm [shape: bf16[32,32], index: 4, kind: input, shape index: {}]   ;;  %s2243_s5 = inlined_call_operand.vmem [shape: f32[1,32], index: 5, kind: input, shape index: {}]   ;;  %s2244_s6 = inlined_call_operand.hbm [shape: f32[2,8,32], index: 6, kind: output, shape index: {}]  }
   0x1   :  { %2256 = sst [smem:[#allocation26_spill]] %s2239_s1 }
   0x2   :  { %2257 = sst [smem:[#allocation27_spill]] %s2242_s4 }
   0x3   :  { %2258 = sst [smem:[#allocation28_spill]] %s2244_s6 }
   0x4   :  { %11 = vsyncpa [#allocation7], 0 }
   0x5   :  { %13 = vsyncpa [#allocation7 + $0x1], 0 }
   0x6   :  { %14 = vsyncpa [#allocation10], 0 }
   0x7   :  { %16 = vsyncpa [#allocation10 + $0x1], 0 }
   0x8   :  { %17 = vsyncpa [#allocation13], 0 }
   0x9   :  { %19 = vsyncpa [#allocation13 + $0x1], 0 }
   0xa   :  { %20 = vsyncpa [#allocation8], 0 }
   0xb   :  { %22 = vsyncpa [#allocation8 + $0x1], 0  ;;  %s1827_s21 = smov 0   ;;  %s1829_s22 = smov 0  }
   0xc   :  { %s1831_s23 = smov 0   ;;  %s1833_s24 = smov 0  }
   0xd   :  { %s1835_s25 = smov 0   ;;  %s1837_s26 = smov 0  }
   0xe LB: > { %2259 = sst [smem:[#allocation21_spill]] %s1755_s21  ;;  %s1858_s27 = sadd.s32 4294967295, %s1775_s26   ;;  %s1775_s26 = sphi %s1837_s26, %s28_s26   ;;  %s1771_s25 = sphi %s1835_s25, %s2292_s25   ;;  %s1767_s24 = sphi %s1833_s24, %s2291_s24   ;;  %s1763_s23 = sphi %s1831_s23, %s2287_s23   ;;  %s1759_s22 = sphi %s1829_s22, %s2290_s22   ;;  %s1755_s21 = sphi %s1827_s21, %s2289_s21  }
   0xf   : > { %2260 = sst [smem:[#allocation22_spill]] %s1763_s23  ;;  %s1298_s28 = sadd.s32 4294967294, %s1775_s26  }
  0x10   : > { %p63_p0 = scmp.ne.s32.totalorder %s1763_s23, %s1759_s22  ;;  %p64_p1 = scmp.eq.s32.totalorder %s1775_s26, 0 }
  0x11   : > { %p69_p2 = scmp.ne.s32.totalorder %s1759_s22, %s1755_s21  ;;  %p2245_p3 = scmp.eq.s32.totalorder %s1858_s27, 0 }
  0x12   : > { %p223_p4 = scmp.eq.s32.totalorder %s1858_s27, 1  ;;  %p1869_p5 = por %p64_p1, %p63_p0 }
  0x13   : > { %p229_p6 = scmp.eq.s32.totalorder %s1298_s28, 1  ;;  %p1875_p7 = por %p2245_p3, %p69_p2 }
  0x14   : > { %p1879_p8 = por %p223_p4, %p63_p0  ;;  %p1299_p10 = scmp.ge.s32.totalorder %s1775_s26, 1 }
  0x15   : > { %p1883_p9 = por %p229_p6, %p69_p2  ;;  %p236_p11 = scmp.lt.s32.totalorder %s1775_s26, 3 }
  0x16   : > { %s1777_s11 = smov [#allocation14]   ;;  %s47_s14 = sadd.s32 1, %s1771_s25 }
  0x17   : > { %s2264_s9 = scalar_select %p1883_p9, 1, 0 }
  0x18   : > { %p1889_p12 = pnand %p1299_p10, %p236_p11  ;;  %s248_s12 = sshll.u32 %s1777_s11, 4  ;;  %s249_s12 = int_to_ptr.vmem [resolvable:$true] %s248_s12 }
  0x19   : > { %2265 = sst [smem:[#allocation23_spill]] %s2264_s9  ;;  %s1905_s15 = sand.u32 1, %s1763_s23  }
  0x1a   : > { %p1434_p13 = pneg %p1889_p12  ;;  %p1907_p2 = scmp.ge.s32.totalorder %s47_s14, 2 }
  0x1b   : > { %s1556_s17 = scalar_lea.vmem %s249_s12, 256  ;;  %p1564_p1 = scmp.lt.s32.totalorder %s249_s12, %s249_s12 }
  0x1c   : > { %p1899_p4 = pnand %p1434_p13, %p2245_p3  ;;  %p1557_p10 = scmp.ne.s32.totalorder %s249_s12, %s1556_s17 }
  0x1d   : > { %p1565_p9 = scmp.lt.s32.totalorder %s1556_s17, %s1556_s17 }
  0x1e   : > { %p1547_p6 = pneg %p1899_p4 }
  0x1f   : > { %p1566_p13 = por %p1565_p9, %p1564_p1 }
  0x20   : > { %p1559_p11 = pnand %p1557_p10, %p1547_p6 }
  0x22   : > { %p1560_p0 = pneg %p1559_p11 }
  0x24   : > { %p1567_p3 = pnand %p1566_p13, %p1560_p0 }
  0x26   : > { %1570 = shalt.err (!%p1567_p3)
}
  0x27   : > { %s2246_s18 = smov 64   ;;  %s2248_s19 = smov 4  }
  0x28   : > { %s2269_s4 = sld [smem:[#allocation27_spill]]  ;;  %s2294_s14 = smov (%p1907_p2, %s47_s14), 0 }
  0x29   : > { %2270 = sst [smem:[#allocation24_spill]] %s2294_s14  ;;  %s1926_s11 = sshll.u32 %s1905_s15, 4 }
  0x2a   : > { %s1929_s17 = sshll.u32 %s1771_s25, 8  ;;  %s51_s29 = ssub.s32 %s1771_s25, %s2294_s14 }
  0x2b   : > { %p2271_p3 = scmp.lt.s32.totalorder %s1775_s26, 2  ;;  %p54_p0 = scmp.eq.s32.totalorder %s51_s29, 0 }
  0x2c   : > { %s2273_s16 = sadd.s32 1, %s1763_s23  ;;  %s2275_s1 = sld [smem:[#allocation26_spill]] }
  0x2d   : > { %p1937_p9 = pnand %p2271_p3, %p1869_p5  ;;  %s1780_s29 = smov [#allocation9]  }
  0x2e   : > { %1437 = dma.hbm_to_vmem [thread:$0]  (!%p1899_p4), %s2269_s4, 256, %s249_s12, [#allocation13], %s2246_s18, %s2246_s18, %s2248_s19  }
  0x2f   : > { %s2252_s12 = sand.u32 1, %s1775_s26   ;;  %s291_s4 = scalar_lea.vmem [#allocation9], %s1926_s11 }
  0x30   : > { %s1945_s20 = scalar_select %p54_p0, %s1763_s23, %s2273_s16  }
  0x31   : > { %s299_s9 = sshll.u32 %s291_s4, 4  ;;  %s1954_s30 = scalar_lea.sflag [#allocation10], %s2252_s12  ;;  %s300_s9 = int_to_ptr.vmem [resolvable:$true] %s299_s9 }
  0x32   : > { %2274 = sst [smem:[#allocation25_spill]] %s1945_s20  ;;  %s298_s19 = scalar_lea.hbm %s2275_s1, %s1929_s17 }
  0x33   : > { %p1573_p5 = pneg %p1937_p9  ;;  %s1584_s14 = scalar_lea.vmem %s300_s9, 256 }
  0x34   : > { %p1585_p1 = scmp.ne.s32.totalorder %s300_s9, %s1584_s14  ;;  %s1589_s16 = sshll.u32 %s1780_s29, 4  ;;  %s1590_s16 = int_to_ptr.vmem [resolvable:$false] %s1589_s16 }
  0x35   : > { %s1591_s20 = scalar_lea.vmem %s1590_s16, 512  ;;  %p1592_p6 = scmp.lt.s32.totalorder %s300_s9, %s1590_s16 }
  0x36   : > { %p1587_p4 = pnand %p1585_p1, %p1573_p5  ;;  %p1593_p10 = scmp.lt.s32.totalorder %s1591_s20, %s1584_s14 }
  0x38   : > { %p1588_p2 = pneg %p1587_p4  ;;  %p1594_p11 = por %p1593_p10, %p1592_p6 }
  0x3a   : > { %p1595_p13 = pnand %p1594_p11, %p1588_p2 }
  0x3c   : > { %1598 = shalt.err (!%p1595_p13)
}
  0x3d   : > { %s2276_s4 = smov 4   ;;  %s2277_s18 = smov 64  }
  0x3e   : > { %1444 = dma.hbm_to_vmem [thread:$0]  (!%p1937_p9), %s298_s19, 256, %s300_s9, %s1954_s30, %s2277_s18, %s2277_s18, %s2276_s4  }
  0x3f   : > { %s276_s12 = scalar_lea.hbm %s2238_s0, %s1929_s17  ;;  %s269_s16 = scalar_lea.vmem [#allocation6], %s1926_s11 }
  0x40   : > { %s277_s14 = sshll.u32 %s269_s16, 4  ;;  %s266_s20 = scalar_lea.sflag [#allocation7], %s1905_s15  ;;  %s278_s14 = int_to_ptr.vmem [resolvable:$true] %s277_s14 }
  0x41   : > { %s1612_s1 = scalar_lea.vmem %s278_s14, 256  ;;  %s1781_s23 = smov [#allocation6]  }
  0x42   : > { %p1613_p3 = scmp.ne.s32.totalorder %s278_s14, %s1612_s1  ;;  %s1617_s21 = sshll.u32 %s1781_s23, 4  ;;  %s1618_s21 = int_to_ptr.vmem [resolvable:$false] %s1617_s21 }
  0x43   : > { %s1619_s6 = scalar_lea.vmem %s1618_s21, 512  ;;  %p1620_p4 = scmp.lt.s32.totalorder %s278_s14, %s1618_s21 }
  0x44   : > { %p1615_p0 = pnand %p1613_p3, %p1573_p5  ;;  %p1621_p2 = scmp.lt.s32.totalorder %s1619_s6, %s1612_s1 }
  0x46   : > { %p1616_p1 = pneg %p1615_p0  ;;  %p1622_p6 = por %p1621_p2, %p1620_p4 }
  0x48   : > { %p1623_p10 = pnand %p1622_p6, %p1616_p1 }
  0x4a   : > { %1626 = shalt.err (!%p1623_p10)
}
  0x4b   : > { %1441 = dma.hbm_to_vmem [thread:$0]  (!%p1937_p9), %s276_s12, 256, %s278_s14, %s266_s20, %s2277_s18, %s2277_s18, %s2276_s4  }
  0x4c   : > { %s320_s23 = scalar_lea.hbm %s2240_s2, %s1929_s17  ;;  %s313_s28 = scalar_lea.vmem [#allocation11], %s1926_s11 }
  0x4d   : > { %s321_s29 = sshll.u32 %s313_s28, 4  ;;  %s1782_s6 = smov [#allocation11]   ;;  %s322_s29 = int_to_ptr.vmem [resolvable:$true] %s321_s29 }
  0x4e   : > { %s1640_s1 = scalar_lea.vmem %s322_s29, 256  ;;  %s1645_s21 = sshll.u32 %s1782_s6, 4  ;;  %s1646_s21 = int_to_ptr.vmem [resolvable:$false] %s1645_s21 }
  0x4f   : > { %p1641_p11 = scmp.ne.s32.totalorder %s322_s29, %s1640_s1  ;;  %s1647_s16 = scalar_lea.vmem %s1646_s21, 512 }
  0x50   : > { %p1648_p0 = scmp.lt.s32.totalorder %s322_s29, %s1646_s21  ;;  %p1649_p1 = scmp.lt.s32.totalorder %s1647_s16, %s1640_s1 }
  0x51   : > { %p1643_p13 = pnand %p1641_p11, %p1573_p5 }
  0x52   : > { %p1650_p4 = por %p1649_p1, %p1648_p0 }
  0x53   : > { %p1644_p3 = pneg %p1643_p13 }
  0x55   : > { %p1651_p2 = pnand %p1650_p4, %p1644_p3 }
  0x57   : > { %1654 = shalt.err (!%p1651_p2)
}
  0x58   : > { %1447 = dma.hbm_to_vmem [thread:$0]  (!%p1937_p9), %s320_s23, 256, %s322_s29, %s1954_s30, %s2277_s18, %s2277_s18, %s2276_s4  }
  0x59   : > { %s1311_s11 = sshll.u32 %s1905_s15, 2  ;;  %s1312_s17 = sshll.u32 %s1771_s25, 6 }
  0x5a   : > { %s342_s20 = scalar_lea.hbm %s2241_s3, %s1312_s17  ;;  %s335_s9 = scalar_lea.vmem [#allocation12], %s1311_s11 }
  0x5b   : > { %s344_s19 = sshll.u32 %s335_s9, 4  ;;  %s2278_s28 = sand.u32 1, %s1775_s26   ;;  %s345_s19 = int_to_ptr.vmem [resolvable:$true] %s344_s19 }
  0x5c   : > { %s332_s1 = scalar_lea.sflag [#allocation13], %s2278_s28  ;;  %s1668_s6 = scalar_lea.vmem %s345_s19, 64 }
  0x5d   : > { %p1669_p6 = scmp.ne.s32.totalorder %s345_s19, %s1668_s6  ;;  %s1783_s21 = smov [#allocation12]  }
  0x5e   : > { %s1673_s16 = sshll.u32 %s1783_s21, 4  ;;  %s1674_s16 = int_to_ptr.vmem [resolvable:$false] %s1673_s16 }
  0x5f   : > { %p1671_p10 = pnand %p1669_p6, %p1573_p5  ;;  %s1675_s15 = scalar_lea.vmem %s1674_s16, 128 }
  0x60   : > { %p1676_p13 = scmp.lt.s32.totalorder %s345_s19, %s1674_s16  ;;  %p1677_p3 = scmp.lt.s32.totalorder %s1675_s15, %s1668_s6 }
  0x61   : > { %p1672_p11 = pneg %p1671_p10 }
  0x62   : > { %p1678_p0 = por %p1677_p3, %p1676_p13 }
  0x64   : > { %p1679_p1 = pnand %p1678_p0, %p1672_p11 }
  0x66   : > { %1682 = shalt.err (!%p1679_p1)
}
  0x67   : > { %1450 = dma.hbm_to_vmem [thread:$0]  (!%p1937_p9), %s342_s20, 64, %s345_s19, %s332_s1  }
  0x68   : > { %353 = sbr.rel (%p1889_p12) target bundleno = 1242 (0x4da), region = 44  ;;  %s2010_s30 = sand.u32 (!%p1889_p12), 1, %s1759_s22  }
  0x69   : > { %s1314_s4 = sshll.u32 (!%p1889_p12), %s2010_s30, 4  ;;  %s356_s18 = scalar_lea.sflag (!%p1889_p12), [#allocation7], %s2010_s30 }
  0x6a   : > { %s2014_s23 = scalar_lea.vmem (!%p1889_p12), [#allocation6], %s1314_s4 }
  0x6d   : > { %1734 = dma.done.wait (%p1875_p7), %s356_s18, 256  }
  0x6e   : > { %1736 = vsyncadd (%p1875_p7), %s356_s18, 4294967040  ;;  %s364_s13 = sand.u32 1, %s1858_s27   ;;  %s2021_s29 = scalar_lea.vmem [#allocation9], %s1314_s4 }
  0x6f   : > { %s365_s10 = scalar_lea.sflag [#allocation10], %s364_s13 }
  0x70   : > { %1738 = dma.done.wait (%p1875_p7), %s365_s10, 512  }
  0x71   : > { %1740 = vsyncadd (%p1875_p7), %s365_s10, 4294966784  ;;  %s1317_s11 = sshll.u32 %s2010_s30, 2  ;;  %s2028_s17 = scalar_lea.vmem [#allocation11], %s1314_s4 }
  0x72   : > { %s383_s12 = scalar_lea.sflag [#allocation13], %s364_s13  ;;  %s2030_s14 = scalar_lea.vmem [#allocation12], %s1317_s11 }
  0x73   : > { %1742 = dma.done.wait (%p1875_p7), %s383_s12, 64  }
  0x74   : > { %1744 = vsyncadd (%p1875_p7), %s383_s12, 4294967232  ;;  %p2279_p12 = scmp.eq.s32.totalorder %s1858_s27, 0 }
  0x76   : > { %1746 = dma.done.wait (%p2279_p12), [#allocation13], 256   ;;  %p2280_p9 = pmov %p2279_p12 }
  0x77   : > { %vm449_vm0 = vcmask 64512   ;;  %v1784_v0 = vmov 0.0   ;;  %vm1785_vm1 = vmmov 0   ;;  %v462_v1 = vld [vmem:[%s2021_s29] sm:$0xf]  ;;  %vm440_vm2 = vcmask 7168  }
  0x78   : > { %1748 = vsyncadd (%p2280_p9), [#allocation13], 4294967040  ;;  %1364 = vmatprep.subr.bf16.mxu0 %v1784_v0  ;;  %1370 = vmatprep.subr.bf16.mxu1 %v1784_v0  ;;  %450 = vst.msk [vmem:[#allocation4] sm:$0xff] %vm449_vm0, %v1784_v0  ;;  %v463_v2 = vld [vmem:[%s2021_s29 + $0x4] sm:$0xf]  ;;  %v473_v4 = vsel %vm449_vm0, %v462_v1, 0 }
  0x79   : > { %451 = vst.msk [vmem:[#allocation4 + $0x8] sm:$0xff] %vm449_vm0, %v1784_v0  ;;  %452 = vst.msk [vmem:[#allocation4 + $0x10] sm:$0xff] %vm449_vm0, %v1784_v0  ;;  %1366 = vmatprep.mubr.msk.bf16.mxu0 %vm1785_vm1, %v1784_v0  ;;  %1372 = vmatprep.mubr.msk.bf16.mxu1 %vm1785_vm1, %v1784_v0  ;;  %v454_v3 = vld [vmem:[%s2014_s23] sm:$0xf]  ;;  %v519_v5 = vsel %vm449_vm0, %v463_v2, 0  ;;  %v1786_v17 = vmov -inf  }
  0x7a   : > { %453 = vst.msk [vmem:[#allocation4 + $0x18] sm:$0xff] %vm449_vm0, %v1784_v0  ;;  %v455_v6 = vld [vmem:[%s2014_s23 + $0x4] sm:$0xf]  ;;  %1365 = vmatpush3.bf16.xpose.msra.mxu0 %v473_v4  ;;  %1371 = vmatpush3.bf16.xpose.msra.mxu1 %v519_v5  ;;  %v458_v7 = vmul.bf16 1043676725, %v454_v3  ;;  %v1787_v44 = vmov 0  }
  0x7b   : > { %1376 = vmatprep.subr.bf16.mxu0 %v1784_v0  ;;  %1382 = vmatprep.subr.bf16.mxu1 %v1784_v0  ;;  %v459_v8 = vmul.bf16 1043676725, %v455_v6  ;;  %v464_v9 = vld [vmem:[%s2021_s29 + $0x8] sm:$0xf]  ;;  %v465_v10 = vld [vmem:[%s2021_s29 + $0xc] sm:$0xf] }
  0x7c   : > { %v565_v11 = vsel %vm449_vm0, %v464_v9, 0  ;;  %v611_v12 = vsel %vm449_vm0, %v465_v10, 0  ;;  %v456_v13 = vld [vmem:[%s2014_s23 + $0x8] sm:$0xf]  ;;  %v457_v14 = vld [vmem:[%s2014_s23 + $0xc] sm:$0xf]  ;;  %1517 = vset.pattern.permute.xlu0 %v1787_v44  ;;  %1518 = vset.pattern.permute.xlu1 %v1787_v44 }
  0x7d   : > { %v460_v15 = vmul.bf16 1043676725, %v456_v13  ;;  %v461_v16 = vmul.bf16 1043676725, %v457_v14  ;;  %441 = vst.msk [vmem:[#allocation2] sm:$0xff] %vm440_vm2, %v1786_v17  ;;  %442 = vst.msk [vmem:[#allocation2 + $0x8] sm:$0xff] %vm440_vm2, %v1786_v17 }
  0x7e   : > { %443 = vst.msk [vmem:[#allocation2 + $0x10] sm:$0xff] %vm440_vm2, %v1786_v17  ;;  %444 = vst.msk [vmem:[#allocation2 + $0x18] sm:$0xff] %vm440_vm2, %v1786_v17  ;;  %v466_v18 = vld [vmem:[%s2030_s14] sm:$0xf]  ;;  %vm785_vm3 = vcmask 1043456   ;;  %s1788_s27 = smov 8  }
  0x7f   : > { %445 = vst.msk [vmem:[#allocation3] sm:$0xff] %vm440_vm2, %v1784_v0  ;;  %446 = vst.msk [vmem:[#allocation3 + $0x8] sm:$0xff] %vm440_vm2, %v1784_v0  ;;  %v467_v19 = vunpack.c.l.bf16 %v466_v18  ;;  %v778_v60 = vld [vmem:[%s2028_s17] sm:$0xf]  ;;  %v779_v63 = vld [vmem:[%s2028_s17 + $0x4] sm:$0xf] }
  0x80   : > { %447 = vst.msk [vmem:[#allocation3 + $0x10] sm:$0xff] %vm440_vm2, %v1784_v0  ;;  %448 = vst.msk [vmem:[#allocation3 + $0x18] sm:$0xff] %vm440_vm2, %v1784_v0  ;;  %v787_v62 = vsel %vm785_vm3, %v778_v60, 0  ;;  %v833_v1 = vsel %vm785_vm3, %v779_v63, 0  ;;  %v780_v14 = vld [vmem:[%s2028_s17 + $0x8] sm:$0xf] }
  0x81   : > { %1367 = vmatmul.mubr.msk.bf16.vlgmr.msra.gmra.mxu0 %vm449_vm0, %v458_v7  ;;  %1373 = vmatmul.mubr.msk.bf16.vlgmr.msra.gmra.mxu1 %vm449_vm0, %v459_v8  ;;  %v879_v17 = vsel %vm785_vm3, %v780_v14, 0  ;;  %v781_v18 = vld [vmem:[%s2028_s17 + $0xc] sm:$0xf]  ;;  %s1789_s7 = smov 16   ;;  %s1790_s20 = smov 24   ;;  %vm1022_vm4 = vcmask 60416  }
  0x82   : > { %1377 = vmatpush3.bf16.xpose.msra.mxu0 %v565_v11  ;;  %1383 = vmatpush3.bf16.xpose.msra.mxu1 %v611_v12  ;;  %vm1030_vm5 = vcmask 126016   ;;  %vm1038_vm6 = vcmask 191616   ;;  %vm1046_vm7 = vcmask 257216   ;;  %vm1072_vm8 = vcmask 261120   ;;  %s1319_s9 = sshll.u32 %s2010_s30, 3  ;;  %s1336_s1 = sshll.u32 %s1767_s24, 7 }
  0x83   : > { %1378 = vmatprep.mubr.msk.bf16.mxu0 %vm1785_vm1, %v1784_v0  ;;  %1384 = vmatprep.mubr.msk.bf16.mxu1 %vm1785_vm1, %v1784_v0  ;;  %s433_s6 = scalar_lea.vmem [#allocation15], %s1319_s9  ;;  %s2281_s4 = sld [smem:[#allocation28_spill]] }
  0x84   : > { %1388 = vmatprep.subr.bf16.mxu0 %v1784_v0  ;;  %1394 = vmatprep.subr.bf16.mxu1 %v1784_v0  ;;  %v2105_v45 = vld [vmem:[#allocation2] sm:$0xff]  ;;  %v2110_v48 = vld [vmem:[#allocation2 + $0x8] sm:$0xff]  ;;  %s1132_s21 = sshll.u32 %s433_s6, 4  ;;  %s1118_s23 = scalar_lea.sflag [#allocation8], %s2010_s30  ;;  %s2192_s21 = int_to_ptr.vmem [resolvable:$true] %s1132_s21 }
  0x85   : > { %v2120_v52 = vld [vmem:[#allocation2 + $0x10] sm:$0xff]  ;;  %v2128_v56 = vld [vmem:[#allocation2 + $0x18] sm:$0xff]  ;;  %s1683_s13 = scalar_lea.vmem %s2192_s21, 128  ;;  %s1791_s24 = smov [#allocation15]  }
  0x86   : > { %p1684_p7 = scmp.ne.s32.totalorder %s2192_s21, %s1683_s13  ;;  %s1687_s10 = sshll.u32 %s1791_s24, 4  ;;  %s1688_s10 = int_to_ptr.vmem [resolvable:$false] %s1687_s10 }
  0x87   : > { %v720_v44 = vld [vmem:[#allocation3 + $0x18] sm:$0xff]  ;;  %s1689_s29 = scalar_lea.vmem %s1688_s10, 256  ;;  %p1690_p2 = scmp.lt.s32.totalorder %s2192_s21, %s1688_s10 }
  0x88   : > { %p1685_p5 = pnand %p1684_p7, %p1879_p8  ;;  %p1691_p6 = scmp.lt.s32.totalorder %s1689_s29, %s1683_s13 }
  0x89   : > { %1379 = vmatmul.mubr.msk.bf16.vlgmr.msra.gmra.mxu0 %vm449_vm0, %v460_v15  ;;  %1385 = vmatmul.mubr.msk.bf16.vlgmr.msra.gmra.mxu1 %vm449_vm0, %v461_v16  ;;  %s2190_s18 = scalar_lea.hbm %s2281_s4, %s1336_s1 }
  0x8a   : > { %1390 = vmatprep.mubr.msk.bf16.mxu0 %vm1785_vm1, %v1784_v0  ;;  %1396 = vmatprep.mubr.msk.bf16.mxu1 %vm1785_vm1, %v1784_v0  ;;  %p1686_p4 = pneg %p1685_p5  ;;  %p1692_p10 = por %p1691_p6, %p1690_p2 }
  0x8b   : > { %1389 = vmatpush3.bf16.msra.mxu0 %v787_v62  ;;  %1395 = vmatpush3.bf16.msra.mxu1 %v833_v1  ;;  %v747_v62 = vld [vmem:[#allocation4 + $0x8] sm:$0xff] }
  0x8c   : > { %1400 = vmatprep.subr.bf16.mxu0 %v1784_v0  ;;  %1406 = vmatprep.subr.bf16.mxu1 %v1784_v0  ;;  %p1693_p11 = pnand %p1692_p10, %p1686_p4 }
 0x141   : > { %v509_v20 = vpop.f32.mrf.mxu0  ;;  %v555_v21 = vpop.f32.mrf.mxu1 }
 0x142   : > { %v2095_v22 = vadd.f32 %v509_v20, %v467_v19  ;;  %v2097_v23 = vadd.f32 %v555_v21, %v467_v19 }
 0x143   : > { %v1368_v24 = vpop.f32.mrf.mxu0  ;;  %v1374_v25 = vpop.f32.mrf.mxu1 }
 0x144   : > { %v657_v26 = vsel %vm449_vm0, %v2095_v22, -inf  ;;  %v660_v29 = vsel %vm449_vm0, %v2097_v23, -inf }
 0x145   : > { %v558_v27 = vpop.f32.mrf.mxu1  ;;  %658 = vmax.xlane.f32.xlu0 %v657_v26  ;;  %v512_v28 = vpop.f32.mrf.mxu0 }
 0x147   : > { %v1369_v30 = vpop.f32.mrf.mxu0  ;;  %v1375_v31 = vpop.f32.mrf.mxu1 }
 0x149   : > { %v647_v32 = vpop.f32.mrf.mxu1  ;;  %661 = vmax.xlane.f32.xlu0 %v660_v29  ;;  %v601_v33 = vpop.f32.mrf.mxu0 }
 0x14a   : > { %v648_v34 = vadd.f32 %v647_v32, %v467_v19  ;;  %v602_v35 = vadd.f32 %v601_v33, %v467_v19 }
 0x14b   : > { %v1380_v36 = vpop.f32.mrf.mxu0  ;;  %v1386_v37 = vpop.f32.mrf.mxu1 }
 0x14c   : > { %v663_v38 = vsel %vm449_vm0, %v602_v35, -inf  ;;  %v666_v41 = vsel %vm449_vm0, %v648_v34, -inf  ;;  %v718_v37 = vld [vmem:[#allocation3 + $0x8] sm:$0xff] }
 0x14d   : > { %v650_v39 = vpop.f32.mrf.mxu1  ;;  %664 = vmax.xlane.f32.xlu1 %v663_v38  ;;  %v604_v40 = vpop.f32.mrf.mxu0 }
 0x14e   : > { %v719_v40 = vld [vmem:[#allocation3 + $0x10] sm:$0xff] }
 0x14f   : > { %v1381_v42 = vpop.f32.mrf.mxu0  ;;  %v1387_v43 = vpop.f32.mrf.mxu1 }
 0x151   : > { %667 = vmax.xlane.f32.xlu1 %v666_v41 }
 0x1ce   : > { %v659_v46 = vpop.xlane.xlu0 %658 }
 0x1cf   : > { %v2108_v47 = vmax.f32 %v2105_v45, %v659_v46 }
 0x1d1   : > { %v673_v49 = vsub.f32 %v2105_v45, %v2108_v47  ;;  %975 = vst.msk [vmem:[#allocation2] sm:$0xff] %vm440_vm2, %v2108_v47  ;;  %687 = vperm.xlu0 %1517, %v2108_v47  }
 0x1d2   : > { %v662_v50 = vpop.xlane.xlu0 %661 }
 0x1d3   : > { %v2118_v51 = vmax.f32 %v2110_v48, %v662_v50  ;;  %v677_v36 = vmul.f32 1.442695, %v673_v49 }
 0x1d5   : > { %v674_v53 = vsub.f32 %v2110_v48, %v2118_v51  ;;  %976 = vst.msk [vmem:[#allocation2 + $0x8] sm:$0xff] %vm440_vm2, %v2118_v51  ;;  %692 = vperm.xlu1 %1518, %v2118_v51  }
 0x1d6   : > { %v665_v54 = vpop.xlane.xlu1 %664 }
 0x1d7   : > { %v671_v55 = vmax.f32 %v2120_v52, %v665_v54  ;;  %v679_v30 = vmul.f32 1.442695, %v674_v53 }
 0x1d9   : > { %v675_v57 = vsub.f32 %v2120_v52, %v671_v55  ;;  %977 = vst.msk [vmem:[#allocation2 + $0x10] sm:$0xff] %vm440_vm2, %v671_v55  ;;  %697 = vperm.xlu1 %1518, %v671_v55   ;;  %v717_v52 = vld [vmem:[#allocation3] sm:$0xff] }
 0x1da   : > { %v668_v58 = vpop.xlane.xlu1 %667 }
 0x1db   : > { %v2133_v59 = vmax.f32 %v2128_v56, %v668_v58  ;;  %v681_v29 = vmul.f32 1.442695, %v675_v57 }
 0x1dd   : > { %v676_v61 = vsub.f32 %v2128_v56, %v2133_v59  ;;  %978 = vst.msk [vmem:[#allocation2 + $0x18] sm:$0xff] %vm440_vm2, %v2133_v59  ;;  %702 = vperm.xlu1 %1518, %v2133_v59  }
 0x1df   : > { %v683_v32 = vmul.f32 1.442695, %v676_v61 }
 0x24c   : > { %v688_v2 = vpop.permute.xlu0 %687 }
 0x24d   : > { %v705_v3 = vsub.f32 %v2095_v22, %v688_v2  ;;  %v925_v22 = vsel %vm785_vm3, %v781_v18, 0 }
 0x24f   : > { %v709_v4 = vmul.f32 1.442695, %v705_v3 }
 0x250   : > { %v693_v5 = vpop.permute.xlu1 %692 }
 0x251   : > { %1521 = vpow2.f32 %v709_v4  ;;  %v706_v6 = vsub.f32 %v2097_v23, %v693_v5  ;;  %v748_v5 = vld [vmem:[#allocation4 + $0x10] sm:$0xff] }
 0x253   : > { %v711_v7 = vmul.f32 1.442695, %v706_v6 }
 0x254   : > { %v698_v8 = vpop.permute.xlu1 %697 }
 0x255   : > { %1523 = vpow2.f32 %v711_v7  ;;  %v707_v9 = vsub.f32 %v602_v35, %v698_v8 }
 0x257   : > { %v713_v10 = vmul.f32 1.442695, %v707_v9 }
 0x258   : > { %v703_v11 = vpop.permute.xlu1 %702 }
 0x259   : > { %1525 = vpow2.f32 %v713_v10  ;;  %v708_v12 = vsub.f32 %v648_v34, %v703_v11 }
 0x25b   : > { %v715_v13 = vmul.f32 1.442695, %v708_v12 }
 0x25d   : > { %1527 = vpow2.f32 %v715_v13  ;;  %v749_v13 = vld [vmem:[#allocation4 + $0x18] sm:$0xff] }
 0x25e   : > { %v1522_v15 = vpop.eup %1521  ;;  %1529 = vpow2.f32 %v681_v29 }
 0x25f   : > { %v774_v16 = vpack.c.bf16 %v1522_v15, %v1522_v15  ;;  %v725_v31 = vsel %vm449_vm0, %v1522_v15, 0.0  ;;  %1531 = vpow2.f32 %v679_v30 }
 0x260   : > { %1533 = vpow2.f32 %v683_v32 }
 0x261   : > { %1391 = vmatmul.mubr.msk.bf16.vlgmr.msra.gmra.mxu0 %vm449_vm0, %v774_v16  ;;  %1535 = vpow2.f32 %v677_v36  ;;  %v746_v36 = vld [vmem:[#allocation4] sm:$0xff] }
 0x262   : > { %v1524_v19 = vpop.eup %1523  ;;  %1401 = vmatpush3.bf16.msra.mxu0 %v879_v17  ;;  %1402 = vmatprep.mubr.msk.bf16.mxu0 %vm1785_vm1, %v1784_v0 }
 0x263   : > { %v728_v20 = vsel %vm449_vm0, %v1524_v19, 0.0  ;;  %v775_v21 = vpack.c.bf16 %v1524_v19, %v1524_v19  ;;  %1412 = vmatprep.subr.bf16.mxu0 %v1784_v0 }
 0x264   : > { %729 = vadd.xlane.f32.xlu1 %v728_v20 }
 0x265   : > { %1397 = vmatmul.mubr.msk.bf16.vlgmr.msra.gmra.mxu1 %vm449_vm0, %v775_v21 }
 0x266   : > { %v1526_v23 = vpop.eup %1525  ;;  %1407 = vmatpush3.bf16.msra.mxu1 %v925_v22  ;;  %1408 = vmatprep.mubr.msk.bf16.mxu1 %vm1785_vm1, %v1784_v0 }
 0x267   : > { %v731_v24 = vsel %vm449_vm0, %v1526_v23, 0.0  ;;  %v776_v25 = vpack.c.bf16 %v1526_v23, %v1526_v23 }
 0x268   : > { %732 = vadd.xlane.f32.xlu0 %v731_v24 }
 0x269   : > { %1403 = vmatmul.mubr.msk.bf16.vlgmr.msra.gmra.mxu0 %vm449_vm0, %v776_v25 }
 0x26a   : > { %v1528_v26 = vpop.eup %1527  ;;  %1416 = vmatprep.mubr.msk.bf16.mxu0 %vm1785_vm1, %v1784_v0 }
 0x26b   : > { %v734_v27 = vsel %vm449_vm0, %v1528_v26, 0.0  ;;  %v777_v28 = vpack.c.bf16 %v1528_v26, %v1528_v26  ;;  %v1530_v33 = vpop.eup %1529 }
 0x26c   : > { %735 = vadd.xlane.f32.xlu1 %v734_v27  ;;  %v1532_v34 = vpop.eup %1531  ;;  %v723_v42 = vmul.f32 %v1530_v33, %v719_v40  ;;  %v1519_v27 = vld [vmem:[#allocation14 + $0x8] sm:$0xff]  }
 0x26d   : > { %1409 = vmatmul.mubr.msk.bf16.vlgmr.msra.gmra.mxu1 %vm449_vm0, %v777_v28  ;;  %v1534_v35 = vpop.eup %1533  ;;  %v722_v38 = vmul.f32 %v1532_v34, %v718_v37  ;;  %1413 = vmatpush3.bf16.msra.mxu0 %v1519_v27 }
 0x26e   : > { %v724_v48 = vmul.f32 %v1534_v35, %v720_v44  ;;  %v1536_v50 = vpop.eup %1535  ;;  %1414 = vmatprep.subr.bf16.mxu0 %v1784_v0 }
 0x26f   : > { %v721_v49 = vmul.f32 %v1536_v50, %v717_v52 }
 0x270   : > { %726 = vadd.xlane.f32.xlu1 %v725_v31  ;;  %v1520_v31 = vld [vmem:[#allocation14] sm:$0xff]  }
 0x271   : > { %1415 = vmatpush3.bf16.msra.mxu0 %v1520_v31 }
 0x27e   : > { %762 = vperm.xlu0 %1517, %v1530_v33  }
 0x281   : > { %757 = vperm.xlu1 %1518, %v1532_v34  }
 0x285   : > { %767 = vperm.xlu1 %1518, %v1534_v35  }
 0x2ed   : > { %v730_v39 = vpop.xlane.xlu1 %729 }
 0x2ee   : > { %v738_v41 = vadd.f32 %v730_v39, %v722_v38 }
 0x2f0   : > { %743 = vst.msk [vmem:[#allocation3 + $0x8] sm:$0xff] %vm440_vm2, %v738_v41 }
 0x2f1   : > { %v733_v43 = vpop.xlane.xlu0 %732 }
 0x2f2   : > { %v739_v46 = vadd.f32 %v733_v43, %v723_v42 }
 0x2f4   : > { %744 = vst.msk [vmem:[#allocation3 + $0x10] sm:$0xff] %vm440_vm2, %v739_v46 }
 0x2f5   : > { %v736_v51 = vpop.xlane.xlu1 %735 }
 0x2f6   : > { %v740_v45 = vadd.f32 %v736_v51, %v724_v48 }
 0x2f7   : > { %v983_v47 = vld [vmem:[#allocation3 + $0x8] sm:$0xff] }
 0x2f8   : > { %745 = vst.msk [vmem:[#allocation3 + $0x18] sm:$0xff] %vm440_vm2, %v740_v45  ;;  %1537 = vrcp.f32 %v983_v47 }
 0x2f9   : > { %v727_v53 = vpop.xlane.xlu1 %726  ;;  %v763_v3 = vpop.permute.xlu0 %762 }
 0x2fa   : > { %v737_v54 = vadd.f32 %v727_v53, %v721_v49  ;;  %v772_v11 = vmul.f32 %v763_v3, %v748_v5  ;;  %v1331_v49 = vld [vmem:[%s2243_s5] ss:$0 sm:$0xff] }
 0x2fb   : > { %v984_v55 = vld [vmem:[#allocation3 + $0x10] sm:$0xff] }
 0x2fc   : > { %742 = vst.msk [vmem:[#allocation3] sm:$0xff] %vm440_vm2, %v737_v54  ;;  %1539 = vrcp.f32 %v984_v55 }
 0x2fd   : > { %v758_v63 = vpop.permute.xlu1 %757 }
 0x2fe   : > { %v771_v4 = vmul.f32 %v758_v63, %v747_v62 }
 0x2ff   : > { %v985_v56 = vld [vmem:[#allocation3 + $0x18] sm:$0xff] }
 0x300   : > { %1541 = vrcp.f32 %v985_v56 }
 0x301   : > { %v768_v12 = vpop.permute.xlu1 %767 }
 0x302   : > { %v773_v19 = vmul.f32 %v768_v12, %v749_v13 }
 0x303   : > { %v982_v57 = vld [vmem:[#allocation3] sm:$0xff] }
 0x304   : > { %1543 = vrcp.f32 %v982_v57 }
 0x305   : > { %v1538_v58 = vpop.eup %1537 }
 0x306   : > { %1001 = vperm.xlu1 %1518, %v1538_v58  }
 0x309   : > { %v1540_v59 = vpop.eup %1539 }
 0x30a   : > { %1006 = vperm.xlu1 %1518, %v1540_v59  }
 0x30d   : > { %v1542_v60 = vpop.eup %1541 }
 0x30e   : > { %1011 = vperm.xlu0 %1517, %v1542_v60   ;;  %752 = vperm.xlu1 %1518, %v1536_v50  }
 0x311   : > { %v1544_v61 = vpop.eup %1543 }
 0x312   : > { %996 = vperm.xlu0 %1517, %v1544_v61  }
 0x321   : > { %v823_v1 = vpop.f32.mrf.mxu0 }
 0x323   : > { %v1392_v2 = vpop.f32.mrf.mxu0 }
 0x325   : > { %v826_v6 = vpop.f32.mrf.mxu0  ;;  %v869_v7 = vpop.f32.mrf.mxu1 }
 0x326   : > { %v968_v8 = vadd.f32 %v869_v7, %v771_v4 }
 0x327   : > { %v1393_v9 = vpop.f32.mrf.mxu0  ;;  %v1398_v10 = vpop.f32.mrf.mxu1 }
 0x328   : > { %972 = vst.msk [vmem:[#allocation4 + $0x8] sm:$0xff] %vm449_vm0, %v968_v8 }
 0x329   : > { %v872_v14 = vpop.f32.mrf.mxu1  ;;  %v915_v15 = vpop.f32.mrf.mxu0 }
 0x32a   : > { %v969_v16 = vadd.f32 %v915_v15, %v772_v11 }
 0x32b   : > { %v1399_v17 = vpop.f32.mrf.mxu1  ;;  %v1404_v18 = vpop.f32.mrf.mxu0 }
 0x32c   : > { %973 = vst.msk [vmem:[#allocation4 + $0x10] sm:$0xff] %vm449_vm0, %v969_v16 }
 0x32d   : > { %v918_v20 = vpop.f32.mrf.mxu0  ;;  %v961_v21 = vpop.f32.mrf.mxu1 }
 0x32e   : > { %v970_v22 = vadd.f32 %v961_v21, %v773_v19 }
 0x32f   : > { %v1405_v23 = vpop.f32.mrf.mxu0  ;;  %v1410_v24 = vpop.f32.mrf.mxu1  ;;  %v991_v28 = vld [vmem:[#allocation4 + $0x8] sm:$0xff] }
 0x330   : > { %974 = vst.msk [vmem:[#allocation4 + $0x18] sm:$0xff] %vm449_vm0, %v970_v22 }
 0x331   : > { %v964_v25 = vpop.f32.mrf.mxu1 }
 0x333   : > { %v1411_v26 = vpop.f32.mrf.mxu1  ;;  %v992_v34 = vld [vmem:[#allocation4 + $0x10] sm:$0xff] }
 0x337   : > { %v993_v38 = vld [vmem:[#allocation4 + $0x18] sm:$0xff] }
 0x381   : > { %v1002_v29 = vpop.permute.xlu1 %1001 }
 0x382   : > { %v1015_v30 = vmul.f32 %v1002_v29, %v991_v28 }
 0x384   : > { %v1342_v32 = vpack.c.bf16 %v1015_v30, %v1015_v30 }
 0x385   : > { %v1007_v33 = vpop.permute.xlu1 %1006 }
 0x386   : > { %v1016_v35 = vmul.f32 %v1007_v33, %v992_v34  ;;  %1027 = vrot.lane.b32.xlu1 %v1342_v32, %s1788_s27 }
 0x388   : > { %v1343_v37 = vpack.c.bf16 %v1016_v35, %v1016_v35 }
 0x389   : > { %v1012_v39 = vpop.permute.xlu0 %1011  ;;  %v753_v40 = vpop.permute.xlu1 %752 }
 0x38a   : > { %v1017_v41 = vmul.f32 %v1012_v39, %v993_v38  ;;  %v770_v42 = vmul.f32 %v753_v40, %v746_v36  ;;  %1035 = vrot.lane.b32.xlu0 %v1343_v37, %s1789_s7 }
 0x38c   : > { %v1344_v43 = vpack.c.bf16 %v1017_v41, %v1017_v41  ;;  %v967_v44 = vadd.f32 %v823_v1, %v770_v42 }
 0x38d   : > { %v997_v46 = vpop.permute.xlu0 %996 }
 0x38e   : > { %971 = vst.msk [vmem:[#allocation4] sm:$0xff] %vm449_vm0, %v967_v44  ;;  %1043 = vrot.lane.b32.xlu1 %v1344_v43, %s1790_s20 }
 0x395   : > { %v990_v0 = vld [vmem:[#allocation4] sm:$0xff] }
 0x396   : > { %v1014_v48 = vmul.f32 %v997_v46, %v990_v0 }
 0x398   : > { %v1018_v50 = vpack.c.bf16 %v1014_v48, %v1014_v48 }
 0x39a   : > { %1023 = vst.msk [vmem:[#allocation5] sm:$0xf] %vm1022_vm4, %v1018_v50 }
 0x3f8   : > { %v1028_v51 = vpop.permute.xlu1 %1027 }
 0x3f9   : > { %1031 = vst.msk [vmem:[#allocation5] sm:$0xf] %vm1030_vm5, %v1028_v51 }
 0x3fc   : > { %v1036_v52 = vpop.permute.xlu0 %1035 }
 0x3fd   : > { %1039 = vst.msk [vmem:[#allocation5] sm:$0xf] %vm1038_vm6, %v1036_v52 }
 0x400   : > { %v1044_v45 = vpop.permute.xlu1 %1043 }
 0x401   : > { %1047 = vst.msk [vmem:[#allocation5] sm:$0xf] %vm1046_vm7, %v1044_v45 }
 0x408   : > { %v1048_v47 = vld [vmem:[#allocation5] sm:$0xf] }
 0x409   : > { %1417 = vmatmul.mubr.msk.bf16.vlgmr.msra.gmra.mxu0 %vm1072_vm8, %v1048_v47 }
 0x4c9   : > { %v1110_v53 = vpop.f32.mrf.mxu0 }
 0x4ca   : > { %v1111_v54 = vadd.f32 %v1331_v49, %v1110_v53 }
 0x4cb   : > { %v1418_v55 = vpop.f32.mrf.mxu0 }
 0x4cc   : > { %1116 = vst.msk [vmem:[%s433_s6] sm:$0xff] %vm1072_vm8, %v1111_v54 }
 0x4cd   : > { %v1113_v56 = vpop.f32.mrf.mxu0 }
 0x4ce   : > { %1696 = shalt.err (!%p1693_p11)
}
 0x4cf   : > { %s1697_s11 = scalar_lea.hbm %s2190_s18, 128  ;;  %s1701_s12 = scalar_lea.hbm %s2281_s4, 256 }
 0x4d0   : > { %p1698_p13 = scmp.ne.s32.totalorder %s2190_s18, %s1697_s11  ;;  %p1702_p1 = scmp.lt.s32.totalorder %s2190_s18, %s2281_s4 }
 0x4d1   : > { %p1703_p12 = scmp.lt.s32.totalorder %s1701_s12, %s1697_s11 }
 0x4d2   : > { %p1699_p3 = pnand %p1698_p13, %p1879_p8 }
 0x4d3   : > { %p1704_p9 = por %p1703_p12, %p1702_p1 }
 0x4d4   : > { %p1700_p0 = pneg %p1699_p3 }
 0x4d6   : > { %p1705_p7 = pnand %p1704_p9, %p1700_p0 }
 0x4d8   : > { %1708 = shalt.err (!%p1705_p7)
}
 0x4d9   : > { %1432 = dma.vmem_to_hbm [thread:$0]  (%p1879_p8), %s2192_s21, 128, %s2190_s18, %s1118_s23   ;;  %v1419_v57 = vpop.f32.mrf.mxu0 }
 0x4da PF: > { %s2282_s7 = sld [smem:[#allocation21_spill]]  ;;  %p2285_p4 = scmp.ge.s32.totalorder %s1775_s26, 2 }
 0x4db   : > { %s2283_s20 = sld [smem:[#allocation23_spill]] }
 0x4e0   : > { %s1144_s9 = sand.u32 1, %s2282_s7  }
 0x4e1   : > { %p2284_p5 = scmp.ne.s32.totalorder %s2283_s20, 0  ;;  %s1145_s19 = scalar_lea.sflag [#allocation8], %s1144_s9 }
 0x4e3   : > { %p1452_p2 = pnand %p2285_p4, %p2284_p5 }
 0x4e5   : > { %p1453_p6 = pneg %p1452_p2 }
 0x4e7   : > { %1750 = dma.done.wait (%p1453_p6), %s1145_s19, 128  }
 0x4e8   : > { %1752 = vsyncadd (%p1453_p6), %s1145_s19, 4294967168  ;;  %s28_s26 = sadd.s32 1, %s1775_s26   ;;  %s2286_s8 = sld [smem:[#allocation22_spill]] }
 0x4e9   : > { %p25_p10 = scmp.ge.s32.totalorder %s28_s26, 4   ;;  %s2287_s23 = sld [smem:[#allocation25_spill]] }
 0x4ea   : > { %s2288_s28 = sld [smem:[#allocation24_spill]]  ;;  %s2289_s21 = smov %s1759_s22 }
 0x4eb   : > { %s2291_s24 = smov %s1771_s25 }
 0x4ec   :  { %27 = sbr.rel (!%p25_p10) target bundleno = 14 (0xe), region = 138 }
 0x4ee   : > { %s2290_s22 = smov %s2286_s8 }
 0x4f0   : > { %s2292_s25 = smov %s2288_s28 }
 0x4f1   :  { %1150 = vsyncpa [#allocation7], 1 }
 0x4f2   :  { %1152 = vsyncpa [#allocation7 + $0x1], 1 }
 0x4f3   :  { %1153 = vsyncpa [#allocation10], 1 }
 0x4f4   :  { %1155 = vsyncpa [#allocation10 + $0x1], 1 }
 0x4f5   :  { %1156 = vsyncpa [#allocation13], 1 }
 0x4f6   :  { %1158 = vsyncpa [#allocation13 + $0x1], 1 }
 0x4f7   :  { %1159 = vsyncpa [#allocation8], 1 }
 0x4f8   :  { %1161 = vsyncpa [#allocation8 + $0x1], 1 }

</bundles_post_ra>
